<compile_context>
chip_gen: v7x
topology: tpu7x:2x2x1
jax: 0.10.0
libtpu: 0.0.40
codegen_flags: <defaults>
</compile_context>

<pallas_src>
import functools

import jax
import jax.numpy as jnp
from jax.experimental import pallas as pl
from jax.experimental.pallas import tpu as pltpu


def _round_up(n, m):
    return ((n + m - 1) // m) * m


def _cdiv(a, b):
    return (a + b - 1) // b


def fc_kernel(x_ref, w1_ref, b1_ref, w2_ref, b2_ref, w3_ref, b3_ref, o_ref):
    # x arrives as f32; cast to bf16 here (rides the VPU slot under the MXU).
    x = x_ref[...].astype(jnp.bfloat16)
    # Layer 1: Linear + ReLU  (bf16 x bf16 -> f32 accumulate on the MXU)
    h1 = jnp.dot(x, w1_ref[...], preferred_element_type=jnp.float32)
    h1 = jnp.maximum(h1 + b1_ref[...], 0.0)          # bias + ReLU in f32
    # Layer 2: Linear + ReLU
    h2 = jnp.dot(h1.astype(jnp.bfloat16), w2_ref[...],
                 preferred_element_type=jnp.float32)
    h2 = jnp.maximum(h2 + b2_ref[...], 0.0)
    # Layer 3: Linear (no activation)
    out = jnp.dot(h2.astype(jnp.bfloat16), w3_ref[...],
                  preferred_element_type=jnp.float32)
    o_ref[...] = (out + b3_ref[...]).astype(o_ref.dtype)


def prepare_params(params):
    """Pad hidden dims to 128 multiples and cast (bf16 weights / f32 biases).

    Done ONCE at parameter-load time so fc_forward launches no pad/convert ops.
    in_dim and out_dim are intentionally left unpadded: their blocks span the
    full array dim (legal per the (8,128) rule) and padding out_dim would
    inflate output HBM writes.
    """
    w1, b1, w2, b2, w3, b3 = params
    in_dim, h1 = w1.shape
    h2 = w2.shape[1]
    out_dim = w3.shape[1]
    h1_p = _round_up(h1, 128)
    h2_p = _round_up(h2, 128)

    def pad2(a, r, c):
        return jnp.pad(a, ((0, r - a.shape[0]), (0, c - a.shape[1])))

    w1p = pad2(w1, in_dim, h1_p).astype(jnp.bfloat16)
    w2p = pad2(w2, h1_p, h2_p).astype(jnp.bfloat16)
    w3p = pad2(w3, h2_p, out_dim).astype(jnp.bfloat16)
    b1p = pad2(b1.reshape(1, -1), 1, h1_p).astype(jnp.float32)
    b2p = pad2(b2.reshape(1, -1), 1, h2_p).astype(jnp.float32)
    b3p = b3.reshape(1, -1).astype(jnp.float32)
    return (w1p, b1p, w2p, b2p, w3p, b3p)


@functools.partial(jax.jit, static_argnames=("max_tile", "single_buffer_residents"))
def fc_forward(x, prepared, max_tile=512, single_buffer_residents=True):
    """x: (batch, in_dim, 1) float32 -> (batch, out_dim) float32."""
    w1p, b1p, w2p, b2p, w3p, b3p = prepared
    x2d = x[..., 0]                               # squeeze(-1) in plain JAX
    batch, in_dim = x2d.shape
    h1_p, h2_p, out_dim = w1p.shape[1], w2p.shape[1], w3p.shape[1]

    # --- Batch tiling: target >=2 grid steps (v7x megacore split of the
    # --- "parallel" axis) when the batch allows, with tiles sized close to
    # --- batch / n_tiles so round_up(batch, tb) barely overshoots.
    n_target = max(2, _cdiv(batch, max_tile))
    tb = min(_round_up(max_tile, 8), _round_up(_cdiv(batch, n_target), 8))
    b_p = _round_up(batch, tb)
    n_tiles = b_p // tb

    if b_p != batch:                              # pad batch rows only if needed
        x2d = jnp.pad(x2d, ((0, b_p - batch), (0, 0)))

    # Batch tile of x / out moves per grid step; weights/biases stay resident.
    x_spec = pl.BlockSpec((tb, in_dim), lambda i: (i, 0))
    o_spec = pl.BlockSpec((tb, out_dim), lambda i: (i, 0))
    if single_buffer_residents:
        # Constant index_map -> never refetched; single buffer halves VMEM.
        resident = lambda shape: pl.BlockSpec(
            shape, lambda i: (0, 0), pipeline_mode=pl.Buffered(1))
    else:
        resident = lambda shape: pl.BlockSpec(shape, lambda i: (0, 0))

    # --- Right-sized VMEM budget: residents (single/double buffered) +
    # --- double-buffered streaming x/out tiles + headroom.
    n_res_buf = 1 if single_buffer_residents else 2
    resident_bytes = ((w1p.size + w2p.size + w3p.size) * 2
                      + (b1p.size + b2p.size + b3p.size) * 4) * n_res_buf
    stream_bytes = 2 * tb * in_dim * 4 + 2 * tb * out_dim * 4
    vmem_limit = int(1.25 * (resident_bytes + stream_bytes)) + (8 << 20)
    vmem_limit = min(max(vmem_limit, 16 << 20), 100 << 20)

    flops = 2 * b_p * (in_dim * h1_p + h1_p * h2_p + h2_p * out_dim)
    bytes_accessed = (b_p * in_dim * 4
                      + (w1p.size + w2p.size + w3p.size) * 2
                      + (b1p.size + b2p.size + b3p.size) * 4
                      + b_p * out_dim * 4)

    out = pl.pallas_call(
        fc_kernel,
        out_shape=jax.ShapeDtypeStruct((b_p, out_dim), jnp.float32),
        grid_spec=pltpu.PrefetchScalarGridSpec(
            num_scalar_prefetch=0,
            grid=(n_tiles,),
            in_specs=[
                x_spec,
                resident((in_dim, h1_p)), resident((1, h1_p)),
                resident((h1_p, h2_p)), resident((1, h2_p)),
                resident((h2_p, out_dim)), resident((1, out_dim)),
            ],
            out_specs=o_spec,
        ),
        compiler_params=pltpu.CompilerParams(
            dimension_semantics=("parallel",),
            vmem_limit_bytes=vmem_limit,
        ),
        cost_estimate=pl.CostEstimate(
            flops=flops, transcendentals=0, bytes_accessed=bytes_accessed),
    )(x2d, w1p, b1p, w2p, b2p, w3p, b3p)

    if b_p != batch:
        out = out[:batch]
    return out


def init_params(key, in_dim, n_hidden_1, n_hidden_2, out_dim):
    """nn.Linear-style U(-1/sqrt(fan_in), 1/sqrt(fan_in)) init.

    Weights stored as (in_features, out_features) (pre-transposed vs PyTorch's
    (out, in) layout) so the kernel does x @ W + b.
    """
    ks = jax.random.split(key, 6)

    def lin(kw, kb, fan_in, fan_out):
        bound = 1.0 / jnp.sqrt(jnp.float32(fan_in))
        w = jax.random.uniform(kw, (fan_in, fan_out), jnp.float32, -bound, bound)
        b = jax.random.uniform(kb, (1, fan_out), jnp.float32, -bound, bound)
        return w, b

    w1, b1 = lin(ks[0], ks[1], in_dim, n_hidden_1)
    w2, b2 = lin(ks[2], ks[3], n_hidden_1, n_hidden_2)
    w3, b3 = lin(ks[4], ks[5], n_hidden_2, out_dim)
    return (w1, b1, w2, b2, w3, b3)


if __name__ == "__main__":
    batch, in_dim, n_hidden_1, n_hidden_2, out_dim = 8, 32, 64, 48, 16

    key = jax.random.PRNGKey(0)
    kx, kp = jax.random.split(key)
    # PyTorch forward does x.squeeze(-1), so the natural input is (B, in_dim, 1).
    x = jax.random.normal(kx, (batch, in_dim, 1), jnp.float32)
    params = init_params(kp, in_dim, n_hidden_1, n_hidden_2, out_dim)
    prepared = prepare_params(params)     # pad/cast weights ONCE, not per call

    try:
        out = jax.block_until_ready(fc_forward(x, prepared))
    except Exception:
        # Fallback if this jax build rejects single-buffered (pl.Buffered(1))
        # resident operands; identical math, default double-buffered residents.
        out = jax.block_until_ready(
            fc_forward(x, prepared, single_buffer_residents=False))

    # Reference in plain JAX, with the same bf16 rounding of matmul inputs.
    w1, b1, w2, b2, w3, b3 = params
    bf = lambda a: a.astype(jnp.bfloat16).astype(jnp.float32)
    x2d = x[..., 0]
    ref = jnp.maximum(bf(x2d) @ bf(w1) + b1, 0.0)
    ref = jnp.maximum(bf(ref) @ bf(w2) + b2, 0.0)
    ref = bf(ref) @ bf(w3) + b3

    assert out.shape == (batch, out_dim)
    assert jnp.allclose(out, ref, atol=1e-2, rtol=1e-2), (
        float(jnp.max(jnp.abs(out - ref))))

    print("KERNEL_OK")
</pallas_src>

<mosaic_0001>
module attributes {stable_mosaic.version = 11 : i64} {
  func.func @fc_kernel(%arg0: i32, %arg1: memref<8x32xf32, #tpu.memory_space<vmem>>, %arg2: memref<32x128xbf16, #tpu.memory_space<vmem>>, %arg3: memref<1x128xf32, #tpu.memory_space<vmem>>, %arg4: memref<128x128xbf16, #tpu.memory_space<vmem>>, %arg5: memref<1x128xf32, #tpu.memory_space<vmem>>, %arg6: memref<128x16xbf16, #tpu.memory_space<vmem>>, %arg7: memref<1x16xf32, #tpu.memory_space<vmem>>, %arg8: memref<8x16xf32, #tpu.memory_space<vmem>>) attributes {dimension_semantics = [#tpu.dimension_semantics<parallel>], iteration_bounds = array<i64: 1>, scalar_prefetch = 0 : i64, scratch_operands = 0 : i64, tpu.core_type = #tpu.core_type<tc>, window_params = [{transform_indices = @transform_0, window_bounds = array<i64: 8, 32>}, {pipeline_mode = #tpu.pipeline_mode<synchronous>, transform_indices = @transform_1, window_bounds = array<i64: 32, 128>}, {pipeline_mode = #tpu.pipeline_mode<synchronous>, transform_indices = @transform_2, window_bounds = array<i64: 1, 128>}, {pipeline_mode = #tpu.pipeline_mode<synchronous>, transform_indices = @transform_3, window_bounds = array<i64: 128, 128>}, {pipeline_mode = #tpu.pipeline_mode<synchronous>, transform_indices = @transform_4, window_bounds = array<i64: 1, 128>}, {pipeline_mode = #tpu.pipeline_mode<synchronous>, transform_indices = @transform_5, window_bounds = array<i64: 128, 16>}, {pipeline_mode = #tpu.pipeline_mode<synchronous>, transform_indices = @transform_6, window_bounds = array<i64: 1, 16>}, {transform_indices = @transform_7, window_bounds = array<i64: 8, 16>}]} {
    %c0 = arith.constant 0 : index
    %c0_0 = arith.constant 0 : index
    %0 = vector.load %arg1[%c0, %c0_0] : memref<8x32xf32, #tpu.memory_space<vmem>>, vector<8x32xf32>
    %1 = arith.truncf %0 : vector<8x32xf32> to vector<8x32xbf16>
    %c0_1 = arith.constant 0 : index
    %c0_2 = arith.constant 0 : index
    %2 = vector.load %arg2[%c0_1, %c0_2] : memref<32x128xbf16, #tpu.memory_space<vmem>>, vector<32x128xbf16>
    %cst = arith.constant dense<0.000000e+00> : vector<8x128xf32>
    %3 = tpu.matmul %1, %2, %cst {dimension_numbers = #tpu.dot_dimension_numbers<[1], [0], [0], [1], [0, 0, 1, 1], [], []>} : vector<8x32xbf16>, vector<32x128xbf16>, vector<8x128xf32> -> vector<8x128xf32>
    %c0_3 = arith.constant 0 : index
    %c0_4 = arith.constant 0 : index
    %4 = vector.load %arg3[%c0_3, %c0_4] : memref<1x128xf32, #tpu.memory_space<vmem>>, vector<1x128xf32>
    %5 = vector.broadcast %4 : vector<1x128xf32> to vector<8x128xf32>
    %6 = arith.addf %3, %5 : vector<8x128xf32>
    %cst_5 = arith.constant 0.000000e+00 : f32
    %7 = vector.broadcast %cst_5 : f32 to vector<8x128xf32>
    %8 = arith.maximumf %6, %7 : vector<8x128xf32>
    %9 = arith.truncf %8 : vector<8x128xf32> to vector<8x128xbf16>
    %c0_6 = arith.constant 0 : index
    %c0_7 = arith.constant 0 : index
    %10 = vector.load %arg4[%c0_6, %c0_7] : memref<128x128xbf16, #tpu.memory_space<vmem>>, vector<128x128xbf16>
    %cst_8 = arith.constant dense<0.000000e+00> : vector<8x128xf32>
    %11 = tpu.matmul %9, %10, %cst_8 {dimension_numbers = #tpu.dot_dimension_numbers<[1], [0], [0], [1], [0, 0, 1, 1], [], []>} : vector<8x128xbf16>, vector<128x128xbf16>, vector<8x128xf32> -> vector<8x128xf32>
    %c0_9 = arith.constant 0 : index
    %c0_10 = arith.constant 0 : index
    %12 = vector.load %arg5[%c0_9, %c0_10] : memref<1x128xf32, #tpu.memory_space<vmem>>, vector<1x128xf32>
    %13 = vector.broadcast %12 : vector<1x128xf32> to vector<8x128xf32>
    %14 = arith.addf %11, %13 : vector<8x128xf32>
    %cst_11 = arith.constant 0.000000e+00 : f32
    %15 = vector.broadcast %cst_11 : f32 to vector<8x128xf32>
    %16 = arith.maximumf %14, %15 : vector<8x128xf32>
    %17 = arith.truncf %16 : vector<8x128xf32> to vector<8x128xbf16>
    %c0_12 = arith.constant 0 : index
    %c0_13 = arith.constant 0 : index
    %18 = vector.load %arg6[%c0_12, %c0_13] : memref<128x16xbf16, #tpu.memory_space<vmem>>, vector<128x16xbf16>
    %cst_14 = arith.constant dense<0.000000e+00> : vector<8x16xf32>
    %19 = tpu.matmul %17, %18, %cst_14 {dimension_numbers = #tpu.dot_dimension_numbers<[1], [0], [0], [1], [0, 0, 1, 1], [], []>} : vector<8x128xbf16>, vector<128x16xbf16>, vector<8x16xf32> -> vector<8x16xf32>
    %c0_15 = arith.constant 0 : index
    %c0_16 = arith.constant 0 : index
    %20 = vector.load %arg7[%c0_15, %c0_16] : memref<1x16xf32, #tpu.memory_space<vmem>>, vector<1x16xf32>
    %21 = vector.broadcast %20 : vector<1x16xf32> to vector<8x16xf32>
    %22 = arith.addf %19, %21 : vector<8x16xf32>
    %c0_17 = arith.constant 0 : index
    %c0_18 = arith.constant 0 : index
    %23 = vector.load %arg8[%c0_17, %c0_18] : memref<8x16xf32, #tpu.memory_space<vmem>>, vector<8x16xf32>
    tpu.vector_store %arg8[%c0_17, %c0_18], %22 {strides = array<i32>} : memref<8x16xf32, #tpu.memory_space<vmem>>, vector<8x16xf32>,
    return
  }
  func.func @transform_0(%arg0: i32) -> (i32, i32) {
    %c0_i32 = arith.constant 0 : i32
    %c0_i32_0 = arith.constant 0 : i32
    return %arg0, %c0_i32 : i32, i32
  }
  func.func @transform_1(%arg0: i32) -> (i32, i32) {
    %c0_i32 = arith.constant 0 : i32
    %c0_i32_0 = arith.constant 0 : i32
    %c0_i32_1 = arith.constant 0 : i32
    return %c0_i32, %c0_i32_0 : i32, i32
  }
  func.func @transform_2(%arg0: i32) -> (i32, i32) {
    %c0_i32 = arith.constant 0 : i32
    %c0_i32_0 = arith.constant 0 : i32
    %c0_i32_1 = arith.constant 0 : i32
    return %c0_i32, %c0_i32_0 : i32, i32
  }
  func.func @transform_3(%arg0: i32) -> (i32, i32) {
    %c0_i32 = arith.constant 0 : i32
    %c0_i32_0 = arith.constant 0 : i32
    %c0_i32_1 = arith.constant 0 : i32
    return %c0_i32, %c0_i32_0 : i32, i32
  }
  func.func @transform_4(%arg0: i32) -> (i32, i32) {
    %c0_i32 = arith.constant 0 : i32
    %c0_i32_0 = arith.constant 0 : i32
    %c0_i32_1 = arith.constant 0 : i32
    return %c0_i32, %c0_i32_0 : i32, i32
  }
  func.func @transform_5(%arg0: i32) -> (i32, i32) {
    %c0_i32 = arith.constant 0 : i32
    %c0_i32_0 = arith.constant 0 : i32
    %c0_i32_1 = arith.constant 0 : i32
    return %c0_i32, %c0_i32_0 : i32, i32
  }
  func.func @transform_6(%arg0: i32) -> (i32, i32) {
    %c0_i32 = arith.constant 0 : i32
    %c0_i32_0 = arith.constant 0 : i32
    %c0_i32_1 = arith.constant 0 : i32
    return %c0_i32, %c0_i32_0 : i32, i32
  }
  func.func @transform_7(%arg0: i32) -> (i32, i32) {
    %c0_i32 = arith.constant 0 : i32
    %c0_i32_0 = arith.constant 0 : i32
    return %arg0, %c0_i32 : i32, i32
  }
}

module attributes {stable_mosaic.version = 11 : i64} {
  func.func @fc_kernel(%arg0: i32, %arg1: memref<8x32xf32, #tpu.memory_space<vmem>>, %arg2: memref<32x128xbf16, #tpu.memory_space<vmem>>, %arg3: memref<1x128xf32, #tpu.memory_space<vmem>>, %arg4: memref<128x128xbf16, #tpu.memory_space<vmem>>, %arg5: memref<1x128xf32, #tpu.memory_space<vmem>>, %arg6: memref<128x16xbf16, #tpu.memory_space<vmem>>, %arg7: memref<1x16xf32, #tpu.memory_space<vmem>>, %arg8: memref<8x16xf32, #tpu.memory_space<vmem>>) attributes {dimension_semantics = [#tpu.dimension_semantics<parallel>], iteration_bounds = array<i64: 1>, scalar_prefetch = 0 : i64, scratch_operands = 0 : i64, tpu.core_type = #tpu.core_type<tc>, window_params = [{transform_indices = @transform_0, window_bounds = array<i64: 8, 32>}, {pipeline_mode = #tpu.pipeline_mode<synchronous>, transform_indices = @transform_1, window_bounds = array<i64: 32, 128>}, {pipeline_mode = #tpu.pipeline_mode<synchronous>, transform_indices = @transform_2, window_bounds = array<i64: 1, 128>}, {pipeline_mode = #tpu.pipeline_mode<synchronous>, transform_indices = @transform_3, window_bounds = array<i64: 128, 128>}, {pipeline_mode = #tpu.pipeline_mode<synchronous>, transform_indices = @transform_4, window_bounds = array<i64: 1, 128>}, {pipeline_mode = #tpu.pipeline_mode<synchronous>, transform_indices = @transform_5, window_bounds = array<i64: 128, 16>}, {pipeline_mode = #tpu.pipeline_mode<synchronous>, transform_indices = @transform_6, window_bounds = array<i64: 1, 16>}, {transform_indices = @transform_7, window_bounds = array<i64: 8, 16>}]} {
    %c0 = arith.constant 0 : index
    %c0_0 = arith.constant 0 : index
    %0 = vector.load %arg1[%c0, %c0_0] : memref<8x32xf32, #tpu.memory_space<vmem>>, vector<8x32xf32>
    %1 = arith.truncf %0 : vector<8x32xf32> to vector<8x32xbf16>
    %c0_1 = arith.constant 0 : index
    %c0_2 = arith.constant 0 : index
    %2 = vector.load %arg2[%c0_1, %c0_2] : memref<32x128xbf16, #tpu.memory_space<vmem>>, vector<32x128xbf16>
    %cst = arith.constant dense<0.000000e+00> : vector<8x128xf32>
    %3 = tpu.matmul %1, %2, %cst {dimension_numbers = #tpu.dot_dimension_numbers<[1], [0], [0], [1], [0, 0, 1, 1], [], []>} : vector<8x32xbf16>, vector<32x128xbf16>, vector<8x128xf32> -> vector<8x128xf32>
    %c0_3 = arith.constant 0 : index
    %c0_4 = arith.constant 0 : index
    %4 = vector.load %arg3[%c0_3, %c0_4] : memref<1x128xf32, #tpu.memory_space<vmem>>, vector<1x128xf32>
    %5 = vector.broadcast %4 : vector<1x128xf32> to vector<8x128xf32>
    %6 = arith.addf %3, %5 : vector<8x128xf32>
    %cst_5 = arith.constant 0.000000e+00 : f32
    %7 = vector.broadcast %cst_5 : f32 to vector<8x128xf32>
    %8 = arith.maximumf %6, %7 : vector<8x128xf32>
    %9 = arith.truncf %8 : vector<8x128xf32> to vector<8x128xbf16>
    %c0_6 = arith.constant 0 : index
    %c0_7 = arith.constant 0 : index
    %10 = vector.load %arg4[%c0_6, %c0_7] : memref<128x128xbf16, #tpu.memory_space<vmem>>, vector<128x128xbf16>
    %cst_8 = arith.constant dense<0.000000e+00> : vector<8x128xf32>
    %11 = tpu.matmul %9, %10, %cst_8 {dimension_numbers = #tpu.dot_dimension_numbers<[1], [0], [0], [1], [0, 0, 1, 1], [], []>} : vector<8x128xbf16>, vector<128x128xbf16>, vector<8x128xf32> -> vector<8x128xf32>
    %c0_9 = arith.constant 0 : index
    %c0_10 = arith.constant 0 : index
    %12 = vector.load %arg5[%c0_9, %c0_10] : memref<1x128xf32, #tpu.memory_space<vmem>>, vector<1x128xf32>
    %13 = vector.broadcast %12 : vector<1x128xf32> to vector<8x128xf32>
    %14 = arith.addf %11, %13 : vector<8x128xf32>
    %cst_11 = arith.constant 0.000000e+00 : f32
    %15 = vector.broadcast %cst_11 : f32 to vector<8x128xf32>
    %16 = arith.maximumf %14, %15 : vector<8x128xf32>
    %17 = arith.truncf %16 : vector<8x128xf32> to vector<8x128xbf16>
    %c0_12 = arith.constant 0 : index
    %c0_13 = arith.constant 0 : index
    %18 = vector.load %arg6[%c0_12, %c0_13] : memref<128x16xbf16, #tpu.memory_space<vmem>>, vector<128x16xbf16>
    %cst_14 = arith.constant dense<0.000000e+00> : vector<8x16xf32>
    %19 = tpu.matmul %17, %18, %cst_14 {dimension_numbers = #tpu.dot_dimension_numbers<[1], [0], [0], [1], [0, 0, 1, 1], [], []>} : vector<8x128xbf16>, vector<128x16xbf16>, vector<8x16xf32> -> vector<8x16xf32>
    %c0_15 = arith.constant 0 : index
    %c0_16 = arith.constant 0 : index
    %20 = vector.load %arg7[%c0_15, %c0_16] : memref<1x16xf32, #tpu.memory_space<vmem>>, vector<1x16xf32>
    %21 = vector.broadcast %20 : vector<1x16xf32> to vector<8x16xf32>
    %22 = arith.addf %19, %21 : vector<8x16xf32>
    %c0_17 = arith.constant 0 : index
    %c0_18 = arith.constant 0 : index
    %23 = vector.load %arg8[%c0_17, %c0_18] : memref<8x16xf32, #tpu.memory_space<vmem>>, vector<8x16xf32>
    tpu.vector_store %arg8[%c0_17, %c0_18], %22 {strides = array<i32>} : memref<8x16xf32, #tpu.memory_space<vmem>>, vector<8x16xf32>,
    return
  }
  func.func @transform_0(%arg0: i32) -> (i32, i32) {
    %c0_i32 = arith.constant 0 : i32
    %c0_i32_0 = arith.constant 0 : i32
    return %arg0, %c0_i32 : i32, i32
  }
  func.func @transform_1(%arg0: i32) -> (i32, i32) {
    %c0_i32 = arith.constant 0 : i32
    %c0_i32_0 = arith.constant 0 : i32
    %c0_i32_1 = arith.constant 0 : i32
    return %c0_i32, %c0_i32_0 : i32, i32
  }
  func.func @transform_2(%arg0: i32) -> (i32, i32) {
    %c0_i32 = arith.constant 0 : i32
    %c0_i32_0 = arith.constant 0 : i32
    %c0_i32_1 = arith.constant 0 : i32
    return %c0_i32, %c0_i32_0 : i32, i32
  }
  func.func @transform_3(%arg0: i32) -> (i32, i32) {
    %c0_i32 = arith.constant 0 : i32
    %c0_i32_0 = arith.constant 0 : i32
    %c0_i32_1 = arith.constant 0 : i32
    return %c0_i32, %c0_i32_0 : i32, i32
  }
  func.func @transform_4(%arg0: i32) -> (i32, i32) {
    %c0_i32 = arith.constant 0 : i32
    %c0_i32_0 = arith.constant 0 : i32
    %c0_i32_1 = arith.constant 0 : i32
    return %c0_i32, %c0_i32_0 : i32, i32
  }
  func.func @transform_5(%arg0: i32) -> (i32, i32) {
    %c0_i32 = arith.constant 0 : i32
    %c0_i32_0 = arith.constant 0 : i32
    %c0_i32_1 = arith.constant 0 : i32
    return %c0_i32, %c0_i32_0 : i32, i32
  }
  func.func @transform_6(%arg0: i32) -> (i32, i32) {
    %c0_i32 = arith.constant 0 : i32
    %c0_i32_0 = arith.constant 0 : i32
    %c0_i32_1 = arith.constant 0 : i32
    return %c0_i32, %c0_i32_0 : i32, i32
  }
  func.func @transform_7(%arg0: i32) -> (i32, i32) {
    %c0_i32 = arith.constant 0 : i32
    %c0_i32_0 = arith.constant 0 : i32
    return %arg0, %c0_i32 : i32, i32
  }
}

</mosaic_0001>

<bundles_post_ra>
// kernel: fc_forward.1
= control target key start
LH: loop header
LB: loop body
LE: loop exit
PB: predicated region body
PF: predicated region fallthrough
CT: control target
= control target key end

     0   :  { %12 = vsyncpa [#allocation3], 0  ;;  %s668_s0 = inlined_call_operand.hbm [shape: f32[8,32], index: 0, kind: input, shape index: {}]   ;;  %s669_s1 = inlined_call_operand.vmem [shape: bf16[32,128], index: 1, kind: input, shape index: {}]   ;;  %s670_s2 = inlined_call_operand.vmem [shape: f32[1,128], index: 2, kind: input, shape index: {}]   ;;  %s671_s3 = inlined_call_operand.vmem [shape: bf16[128,128], index: 3, kind: input, shape index: {}]   ;;  %s672_s4 = inlined_call_operand.vmem [shape: f32[1,128], index: 4, kind: input, shape index: {}]   ;;  %s673_s5 = inlined_call_operand.vmem [shape: bf16[128,16], index: 5, kind: input, shape index: {}]   ;;  %s674_s6 = inlined_call_operand.vmem [shape: f32[1,16], index: 6, kind: input, shape index: {}]   ;;  %s675_s7 = inlined_call_operand.hbm [shape: f32[8,16], index: 7, kind: output, shape index: {}]  }
   0x1   :  { %13 = vsyncpa [#allocation4], 0  ;;  %s513_s24 = smov [#allocation2]   ;;  %s465_s28 = scalar_lea.hbm %s668_s0, 128 }
   0x2   :  { %s20_s25 = sshll.u32 %s513_s24, 4  ;;  %p466_p0 = scmp.ne.s32.totalorder %s668_s0, %s465_s28  ;;  %s21_s25 = int_to_ptr.vmem [resolvable:$true] %s20_s25 }
   0x3   :  { %p469_p1 = scmp.lt.u32.totalorder %s465_s28, %s668_s0 }
   0x5   :  { %p471_p2 = pnand %p469_p1, %p466_p0 }
   0x7   :  { %474 = shalt.err (!%p471_p2)
}
   0x8   :  { %s475_s10 = scalar_lea.vmem %s21_s25, 128  ;;  %p480_p4 = scmp.lt.s32.totalorder %s21_s25, %s21_s25 }
   0x9   :  { %p476_p3 = scmp.ne.s32.totalorder %s21_s25, %s475_s10  ;;  %p481_p5 = scmp.lt.s32.totalorder %s475_s10, %s475_s10 }
   0xb   :  { %p482_p6 = por %p481_p5, %p480_p4 }
   0xd   :  { %p483_p7 = pnand %p482_p6, %p476_p3 }
   0xf   :  { %486 = shalt.err (!%p483_p7)
}
  0x10   :  { %23 = dma.hbm_to_vmem [thread:$0]  %s668_s0, 128, %s21_s25, [#allocation3]  }
  0x11   :  { %509 = dma.done.wait [#allocation3], 128  }
  0x12   :  { %510 = vsyncadd [#allocation3], 4294967168  ;;  %v514_v0 = vmov 0.0   ;;  %vm515_vm0 = vmmov 0   ;;  %v447_v1 = vld [vmem:[%s669_s1] sm:$0xff]   ;;  %v448_v2 = vld [vmem:[%s669_s1 + $0x8] sm:$0xff]  }
  0x13   :  { %395 = vmatprep.subr.bf16.mxu0 %v514_v0  ;;  %399 = vmatprep.mubr.msk.bf16.mxu0 %vm515_vm0, %v514_v0  ;;  %v40_v3 = vld [vmem:[#allocation2] sm:$0xff]  ;;  %v450_v6 = vld [vmem:[%s671_s3 + $0x8] sm:$0xff]   ;;  %vm65_vm1 = vcmask 261120   ;;  %v451_v7 = vld [vmem:[%s671_s3 + $0x10] sm:$0xff]   ;;  %s516_s26 = smov [#allocation5]   ;;  %vm335_vm2 = vcmask 130048  }
  0x14   :  { %403 = vmatprep.subr.bf16.mxu1 %v514_v0  ;;  %419 = vmatprep.mubr.msk.bf16.mxu1 %vm515_vm0, %v514_v0  ;;  %v449_v4 = vld [vmem:[%s671_s3] sm:$0xff]   ;;  %v41_v5 = vpack.c.bf16 %v40_v3, %v40_v3  ;;  %v452_v8 = vld [vmem:[%s671_s3 + $0x18] sm:$0xff]   ;;  %v454_v10 = vld [vmem:[%s671_s3 + $0x28] sm:$0xff]   ;;  %s343_s27 = sshll.u32 %s516_s26, 4  ;;  %s344_s27 = int_to_ptr.vmem [resolvable:$true] %s343_s27 }
  0x15   :  { %396 = vmatpush3.bf16.msra.mxu0 %v447_v1  ;;  %404 = vmatpush3.bf16.msra.mxu1 %v449_v4  ;;  %v453_v9 = vld [vmem:[%s671_s3 + $0x20] sm:$0xff]   ;;  %v455_v11 = vld [vmem:[%s671_s3 + $0x30] sm:$0xff]   ;;  %v456_v12 = vld [vmem:[%s671_s3 + $0x38] sm:$0xff]   ;;  %p492_p9 = scmp.lt.s32.totalorder %s344_s27, %s344_s27 }
  0x16   :  { %397 = vmatprep.subr.bf16.mxu0 %v514_v0  ;;  %405 = vmatprep.subr.bf16.mxu1 %v514_v0  ;;  %v457_v13 = vld [vmem:[%s673_s5] sm:$0xff]   ;;  %v458_v14 = vld [vmem:[%s673_s5 + $0x8] sm:$0xff]   ;;  %v459_v15 = vld [vmem:[%s673_s5 + $0x10] sm:$0xff]  }
  0x17   :  { %v460_v16 = vld [vmem:[%s673_s5 + $0x18] sm:$0xff]   ;;  %v461_v17 = vld [vmem:[%s673_s5 + $0x20] sm:$0xff]   ;;  %v462_v18 = vld [vmem:[%s673_s5 + $0x28] sm:$0xff]  }
  0x18   :  { %v352_v19 = vld [vmem:[%s670_s2] ss:$0 sm:$0xff]  ;;  %v463_v27 = vld [vmem:[%s673_s5 + $0x30] sm:$0xff]   ;;  %v464_v28 = vld [vmem:[%s673_s5 + $0x38] sm:$0xff]  }
  0x19   :  { %398 = vmatpush3.bf16.msra.mxu0 %v448_v2  ;;  %406 = vmatpush3.bf16.msra.mxu1 %v450_v6  ;;  %v356_v29 = vld [vmem:[%s672_s4] ss:$0 sm:$0xff]  ;;  %s487_s4 = scalar_lea.vmem %s344_s27, 128 }
  0x1a   :  { %423 = vmatprep.subr.bf16.mxu0 %v514_v0  ;;  %407 = vmatprep.subr.bf16.mxu1 %v514_v0  ;;  %v365_v37 = vld [vmem:[%s674_s6] ss:$0 sm:$0xff]  ;;  %p488_p8 = scmp.ne.s32.totalorder %s344_s27, %s487_s4  ;;  %p493_p10 = scmp.lt.s32.totalorder %s487_s4, %s487_s4 }
  0x1c   :  { %400 = vmatmul.mubr.msk.bf16.vlgmr.msra.gmra.mrb[0].mxu0 %vm65_vm1, %v41_v5  ;;  %p494_p11 = por %p493_p10, %p492_p9 }
  0x1d   :  { %439 = vmatprep.mubr.msk.bf16.mxu0 %vm515_vm0, %v514_v0  ;;  %408 = vmatpush3.bf16.msra.mxu1 %v451_v7 }
  0x1e   :  { %409 = vmatprep.subr.bf16.mxu1 %v514_v0  ;;  %424 = vmatpush3.bf16.msra.mxu0 %v457_v13  ;;  %p495_p12 = pnand %p494_p11, %p488_p8 }
  0x1f   :  { %425 = vmatprep.subr.bf16.mxu0 %v514_v0 }
  0x21   :  { %410 = vmatpush3.bf16.msra.mxu1 %v452_v8 }
  0x22   :  { %411 = vmatprep.subr.bf16.mxu1 %v514_v0  ;;  %426 = vmatpush3.bf16.msra.mxu0 %v458_v14 }
  0x23   :  { %427 = vmatprep.subr.bf16.mxu0 %v514_v0 }
  0x25   :  { %412 = vmatpush3.bf16.msra.mxu1 %v453_v9 }
  0x26   :  { %413 = vmatprep.subr.bf16.mxu1 %v514_v0  ;;  %428 = vmatpush3.bf16.msra.mxu0 %v459_v15 }
  0x27   :  { %429 = vmatprep.subr.bf16.mxu0 %v514_v0 }
  0x29   :  { %414 = vmatpush3.bf16.msra.mxu1 %v454_v10 }
  0x2a   :  { %415 = vmatprep.subr.bf16.mxu1 %v514_v0  ;;  %430 = vmatpush3.bf16.msra.mxu0 %v460_v16 }
  0x2b   :  { %431 = vmatprep.subr.bf16.mxu0 %v514_v0 }
  0x2d   :  { %416 = vmatpush3.bf16.msra.mxu1 %v455_v11 }
  0x2e   :  { %417 = vmatprep.subr.bf16.mxu1 %v514_v0  ;;  %432 = vmatpush3.bf16.msra.mxu0 %v461_v17 }
  0x2f   :  { %433 = vmatprep.subr.bf16.mxu0 %v514_v0 }
  0x31   :  { %418 = vmatpush3.bf16.msra.mxu1 %v456_v12 }
  0x32   :  { %434 = vmatpush3.bf16.msra.mxu0 %v462_v18 }
  0x33   :  { %435 = vmatprep.subr.bf16.mxu0 %v514_v0 }
  0x36   :  { %436 = vmatpush3.bf16.msra.mxu0 %v463_v27 }
  0x37   :  { %437 = vmatprep.subr.bf16.mxu0 %v514_v0 }
  0x3a   :  { %438 = vmatpush3.bf16.msra.mxu0 %v464_v28 }
  0xef   :  { %v103_v20 = vpop.f32.mrb[0].mxu0 }
  0xf0   :  { %v104_v21 = vadd.f32 %v352_v19, %v103_v20  ;;  %v401_v22 = vpop.f32.mrb[1].mxu0 }
  0xf1   :  { %v106_v23 = vpop.f32.mrb[2].mxu0 }
  0xf2   :  { %v109_v24 = vmax.f32 %v104_v21, 0.0  ;;  %v402_v25 = vpop.f32.mrb[3].mxu0 }
  0xf4   :  { %v110_v26 = vpack.c.bf16 %v109_v24, %v109_v24 }
  0xf6   :  { %420 = vmatmul.mubr.bf16.vlgmr.msra.gmra.mrb[0].mxu1 %v110_v26 }
 0x1c9   :  { %v216_v30 = vpop.f32.mrb[0].mxu1 }
 0x1ca   :  { %v217_v31 = vadd.f32 %v356_v29, %v216_v30  ;;  %v421_v32 = vpop.f32.mrb[1].mxu1 }
 0x1cb   :  { %v219_v33 = vpop.f32.mrb[2].mxu1 }
 0x1cc   :  { %v222_v34 = vmax.f32 %v217_v31, 0.0  ;;  %v422_v35 = vpop.f32.mrb[3].mxu1 }
 0x1ce   :  { %v223_v36 = vpack.c.bf16 %v222_v34, %v222_v34 }
 0x1d0   :  { %440 = vmatmul.mubr.bf16.vlgmr.msra.gmra.mrb[4].mxu0 %v223_v36 }
 0x2a3   :  { %v329_v38 = vpop.f32.mrb[4].mxu0 }
 0x2a4   :  { %v330_v39 = vadd.f32 %v365_v37, %v329_v38  ;;  %v441_v40 = vpop.f32.mrb[5].mxu0 }
 0x2a5   :  { %v332_v41 = vpop.f32.mrb[6].mxu0 }
 0x2a6   :  { %v442_v42 = vpop.f32.mrb[7].mxu0  ;;  %336 = vst.msk [vmem:[#allocation5] sm:$0xff] %vm335_vm2, %v330_v39 }
 0x2a7   :  { %498 = shalt.err (!%p495_p12)
}
 0x2a8   :  { %s499_s6 = scalar_lea.hbm %s675_s7, 128 }
 0x2a9   :  { %p500_p13 = scmp.ne.s32.totalorder %s675_s7, %s499_s6  ;;  %p503_p0 = scmp.lt.u32.totalorder %s499_s6, %s675_s7 }
 0x2ab   :  { %p505_p1 = pnand %p503_p0, %p500_p13 }
 0x2ad   :  { %508 = shalt.err (!%p505_p1)
}
 0x2ae   :  { %346 = dma.vmem_to_hbm [thread:$0]  %s344_s27, 128, %s675_s7, [#allocation4]  }
 0x2af   :  { %511 = dma.done.wait [#allocation4], 128  }
 0x2b0   :  { %512 = vsyncadd [#allocation4], 4294967168 }
 0x2b1   :  { %350 = vsyncpa [#allocation3], 1 }
 0x2b2   :  { %351 = vsyncpa [#allocation4], 1 }

// kernel: fc_forward.1
= control target key start
LH: loop header
LB: loop body
LE: loop exit
PB: predicated region body
PF: predicated region fallthrough
CT: control target
= control target key end

     0   :  { %12 = vsyncpa [#allocation3], 0  ;;  %s668_s0 = inlined_call_operand.hbm [shape: f32[8,32], index: 0, kind: input, shape index: {}]   ;;  %s669_s1 = inlined_call_operand.vmem [shape: bf16[32,128], index: 1, kind: input, shape index: {}]   ;;  %s670_s2 = inlined_call_operand.vmem [shape: f32[1,128], index: 2, kind: input, shape index: {}]   ;;  %s671_s3 = inlined_call_operand.vmem [shape: bf16[128,128], index: 3, kind: input, shape index: {}]   ;;  %s672_s4 = inlined_call_operand.vmem [shape: f32[1,128], index: 4, kind: input, shape index: {}]   ;;  %s673_s5 = inlined_call_operand.vmem [shape: bf16[128,16], index: 5, kind: input, shape index: {}]   ;;  %s674_s6 = inlined_call_operand.vmem [shape: f32[1,16], index: 6, kind: input, shape index: {}]   ;;  %s675_s7 = inlined_call_operand.hbm [shape: f32[8,16], index: 7, kind: output, shape index: {}]  }
   0x1   :  { %13 = vsyncpa [#allocation4], 0  ;;  %s513_s24 = smov [#allocation2]   ;;  %s465_s28 = scalar_lea.hbm %s668_s0, 128 }
   0x2   :  { %s20_s25 = sshll.u32 %s513_s24, 4  ;;  %p466_p0 = scmp.ne.s32.totalorder %s668_s0, %s465_s28  ;;  %s21_s25 = int_to_ptr.vmem [resolvable:$true] %s20_s25 }
   0x3   :  { %p469_p1 = scmp.lt.u32.totalorder %s465_s28, %s668_s0 }
   0x5   :  { %p471_p2 = pnand %p469_p1, %p466_p0 }
   0x7   :  { %474 = shalt.err (!%p471_p2)
}
   0x8   :  { %s475_s10 = scalar_lea.vmem %s21_s25, 128  ;;  %p480_p4 = scmp.lt.s32.totalorder %s21_s25, %s21_s25 }
   0x9   :  { %p476_p3 = scmp.ne.s32.totalorder %s21_s25, %s475_s10  ;;  %p481_p5 = scmp.lt.s32.totalorder %s475_s10, %s475_s10 }
   0xb   :  { %p482_p6 = por %p481_p5, %p480_p4 }
   0xd   :  { %p483_p7 = pnand %p482_p6, %p476_p3 }
   0xf   :  { %486 = shalt.err (!%p483_p7)
}
  0x10   :  { %23 = dma.hbm_to_vmem [thread:$0]  %s668_s0, 128, %s21_s25, [#allocation3]  }
  0x11   :  { %509 = dma.done.wait [#allocation3], 128  }
  0x12   :  { %510 = vsyncadd [#allocation3], 4294967168  ;;  %v514_v0 = vmov 0.0   ;;  %vm515_vm0 = vmmov 0   ;;  %v447_v1 = vld [vmem:[%s669_s1] sm:$0xff]   ;;  %v448_v2 = vld [vmem:[%s669_s1 + $0x8] sm:$0xff]  }
  0x13   :  { %395 = vmatprep.subr.bf16.mxu0 %v514_v0  ;;  %399 = vmatprep.mubr.msk.bf16.mxu0 %vm515_vm0, %v514_v0  ;;  %v40_v3 = vld [vmem:[#allocation2] sm:$0xff]  ;;  %v450_v6 = vld [vmem:[%s671_s3 + $0x8] sm:$0xff]   ;;  %vm65_vm1 = vcmask 261120   ;;  %v451_v7 = vld [vmem:[%s671_s3 + $0x10] sm:$0xff]   ;;  %s516_s26 = smov [#allocation5]   ;;  %vm335_vm2 = vcmask 130048  }
  0x14   :  { %403 = vmatprep.subr.bf16.mxu1 %v514_v0  ;;  %419 = vmatprep.mubr.msk.bf16.mxu1 %vm515_vm0, %v514_v0  ;;  %v449_v4 = vld [vmem:[%s671_s3] sm:$0xff]   ;;  %v41_v5 = vpack.c.bf16 %v40_v3, %v40_v3  ;;  %v452_v8 = vld [vmem:[%s671_s3 + $0x18] sm:$0xff]   ;;  %v454_v10 = vld [vmem:[%s671_s3 + $0x28] sm:$0xff]   ;;  %s343_s27 = sshll.u32 %s516_s26, 4  ;;  %s344_s27 = int_to_ptr.vmem [resolvable:$true] %s343_s27 }
  0x15   :  { %396 = vmatpush3.bf16.msra.mxu0 %v447_v1  ;;  %404 = vmatpush3.bf16.msra.mxu1 %v449_v4  ;;  %v453_v9 = vld [vmem:[%s671_s3 + $0x20] sm:$0xff]   ;;  %v455_v11 = vld [vmem:[%s671_s3 + $0x30] sm:$0xff]   ;;  %v456_v12 = vld [vmem:[%s671_s3 + $0x38] sm:$0xff]   ;;  %p492_p9 = scmp.lt.s32.totalorder %s344_s27, %s344_s27 }
  0x16   :  { %397 = vmatprep.subr.bf16.mxu0 %v514_v0  ;;  %405 = vmatprep.subr.bf16.mxu1 %v514_v0  ;;  %v457_v13 = vld [vmem:[%s673_s5] sm:$0xff]   ;;  %v458_v14 = vld [vmem:[%s673_s5 + $0x8] sm:$0xff]   ;;  %v459_v15 = vld [vmem:[%s673_s5 + $0x10] sm:$0xff]  }
  0x17   :  { %v460_v16 = vld [vmem:[%s673_s5 + $0x18] sm:$0xff]   ;;  %v461_v17 = vld [vmem:[%s673_s5 + $0x20] sm:$0xff]   ;;  %v462_v18 = vld [vmem:[%s673_s5 + $0x28] sm:$0xff]  }
  0x18   :  { %v352_v19 = vld [vmem:[%s670_s2] ss:$0 sm:$0xff]  ;;  %v463_v27 = vld [vmem:[%s673_s5 + $0x30] sm:$0xff]   ;;  %v464_v28 = vld [vmem:[%s673_s5 + $0x38] sm:$0xff]  }
  0x19   :  { %398 = vmatpush3.bf16.msra.mxu0 %v448_v2  ;;  %406 = vmatpush3.bf16.msra.mxu1 %v450_v6  ;;  %v356_v29 = vld [vmem:[%s672_s4] ss:$0 sm:$0xff]  ;;  %s487_s4 = scalar_lea.vmem %s344_s27, 128 }
  0x1a   :  { %423 = vmatprep.subr.bf16.mxu0 %v514_v0  ;;  %407 = vmatprep.subr.bf16.mxu1 %v514_v0  ;;  %v365_v37 = vld [vmem:[%s674_s6] ss:$0 sm:$0xff]  ;;  %p488_p8 = scmp.ne.s32.totalorder %s344_s27, %s487_s4  ;;  %p493_p10 = scmp.lt.s32.totalorder %s487_s4, %s487_s4 }
  0x1c   :  { %400 = vmatmul.mubr.msk.bf16.vlgmr.msra.gmra.mrb[0].mxu0 %vm65_vm1, %v41_v5  ;;  %p494_p11 = por %p493_p10, %p492_p9 }
  0x1d   :  { %439 = vmatprep.mubr.msk.bf16.mxu0 %vm515_vm0, %v514_v0  ;;  %408 = vmatpush3.bf16.msra.mxu1 %v451_v7 }
  0x1e   :  { %409 = vmatprep.subr.bf16.mxu1 %v514_v0  ;;  %424 = vmatpush3.bf16.msra.mxu0 %v457_v13  ;;  %p495_p12 = pnand %p494_p11, %p488_p8 }
  0x1f   :  { %425 = vmatprep.subr.bf16.mxu0 %v514_v0 }
  0x21   :  { %410 = vmatpush3.bf16.msra.mxu1 %v452_v8 }
  0x22   :  { %411 = vmatprep.subr.bf16.mxu1 %v514_v0  ;;  %426 = vmatpush3.bf16.msra.mxu0 %v458_v14 }
  0x23   :  { %427 = vmatprep.subr.bf16.mxu0 %v514_v0 }
  0x25   :  { %412 = vmatpush3.bf16.msra.mxu1 %v453_v9 }
  0x26   :  { %413 = vmatprep.subr.bf16.mxu1 %v514_v0  ;;  %428 = vmatpush3.bf16.msra.mxu0 %v459_v15 }
  0x27   :  { %429 = vmatprep.subr.bf16.mxu0 %v514_v0 }
  0x29   :  { %414 = vmatpush3.bf16.msra.mxu1 %v454_v10 }
  0x2a   :  { %415 = vmatprep.subr.bf16.mxu1 %v514_v0  ;;  %430 = vmatpush3.bf16.msra.mxu0 %v460_v16 }
  0x2b   :  { %431 = vmatprep.subr.bf16.mxu0 %v514_v0 }
  0x2d   :  { %416 = vmatpush3.bf16.msra.mxu1 %v455_v11 }
  0x2e   :  { %417 = vmatprep.subr.bf16.mxu1 %v514_v0  ;;  %432 = vmatpush3.bf16.msra.mxu0 %v461_v17 }
  0x2f   :  { %433 = vmatprep.subr.bf16.mxu0 %v514_v0 }
  0x31   :  { %418 = vmatpush3.bf16.msra.mxu1 %v456_v12 }
  0x32   :  { %434 = vmatpush3.bf16.msra.mxu0 %v462_v18 }
  0x33   :  { %435 = vmatprep.subr.bf16.mxu0 %v514_v0 }
  0x36   :  { %436 = vmatpush3.bf16.msra.mxu0 %v463_v27 }
  0x37   :  { %437 = vmatprep.subr.bf16.mxu0 %v514_v0 }
  0x3a   :  { %438 = vmatpush3.bf16.msra.mxu0 %v464_v28 }
  0xef   :  { %v103_v20 = vpop.f32.mrb[0].mxu0 }
  0xf0   :  { %v104_v21 = vadd.f32 %v352_v19, %v103_v20  ;;  %v401_v22 = vpop.f32.mrb[1].mxu0 }
  0xf1   :  { %v106_v23 = vpop.f32.mrb[2].mxu0 }
  0xf2   :  { %v109_v24 = vmax.f32 %v104_v21, 0.0  ;;  %v402_v25 = vpop.f32.mrb[3].mxu0 }
  0xf4   :  { %v110_v26 = vpack.c.bf16 %v109_v24, %v109_v24 }
  0xf6   :  { %420 = vmatmul.mubr.bf16.vlgmr.msra.gmra.mrb[0].mxu1 %v110_v26 }
 0x1c9   :  { %v216_v30 = vpop.f32.mrb[0].mxu1 }
 0x1ca   :  { %v217_v31 = vadd.f32 %v356_v29, %v216_v30  ;;  %v421_v32 = vpop.f32.mrb[1].mxu1 }
 0x1cb   :  { %v219_v33 = vpop.f32.mrb[2].mxu1 }
 0x1cc   :  { %v222_v34 = vmax.f32 %v217_v31, 0.0  ;;  %v422_v35 = vpop.f32.mrb[3].mxu1 }
 0x1ce   :  { %v223_v36 = vpack.c.bf16 %v222_v34, %v222_v34 }
 0x1d0   :  { %440 = vmatmul.mubr.bf16.vlgmr.msra.gmra.mrb[4].mxu0 %v223_v36 }
 0x2a3   :  { %v329_v38 = vpop.f32.mrb[4].mxu0 }
 0x2a4   :  { %v330_v39 = vadd.f32 %v365_v37, %v329_v38  ;;  %v441_v40 = vpop.f32.mrb[5].mxu0 }
 0x2a5   :  { %v332_v41 = vpop.f32.mrb[6].mxu0 }
 0x2a6   :  { %v442_v42 = vpop.f32.mrb[7].mxu0  ;;  %336 = vst.msk [vmem:[#allocation5] sm:$0xff] %vm335_vm2, %v330_v39 }
 0x2a7   :  { %498 = shalt.err (!%p495_p12)
}
 0x2a8   :  { %s499_s6 = scalar_lea.hbm %s675_s7, 128 }
 0x2a9   :  { %p500_p13 = scmp.ne.s32.totalorder %s675_s7, %s499_s6  ;;  %p503_p0 = scmp.lt.u32.totalorder %s499_s6, %s675_s7 }
 0x2ab   :  { %p505_p1 = pnand %p503_p0, %p500_p13 }
 0x2ad   :  { %508 = shalt.err (!%p505_p1)
}
 0x2ae   :  { %346 = dma.vmem_to_hbm [thread:$0]  %s344_s27, 128, %s675_s7, [#allocation4]  }
 0x2af   :  { %511 = dma.done.wait [#allocation4], 128  }
 0x2b0   :  { %512 = vsyncadd [#allocation4], 4294967168 }
 0x2b1   :  { %350 = vsyncpa [#allocation3], 1 }
 0x2b2   :  { %351 = vsyncpa [#allocation4], 1 }

</bundles_post_ra>
